<compile_context>
chip_gen: v5e
topology: v5e:2x2
jax: 0.10.0
libtpu: 0.0.40
codegen_flags: <defaults>
</compile_context>

<pallas_src>
import math
import jax
import jax.numpy as jnp
from jax.experimental import pallas as pl
from jax.experimental.pallas import tpu as pltpu


def _round_up(n, m):
    return ((n + m - 1) // m) * m


def dqn_kernel(x_ref, w1_ref, b1_ref, w2_ref, b2_ref, o_ref):
    # Layer 1: relu(x @ W1 + b1).  bf16 operands -> MXU, f32 accumulation.
    h = jnp.dot(x_ref[...], w1_ref[...], preferred_element_type=jnp.float32)
    h = jnp.maximum(h + b1_ref[...], 0.0)          # f32 elementwise (v5e-safe)
    # Layer 2: relu(h @ W2 + b2).  Re-quantize h to bf16 for the MXU.
    y = jnp.dot(h.astype(jnp.bfloat16), w2_ref[...],
                preferred_element_type=jnp.float32)
    o_ref[...] = jnp.maximum(y + b2_ref[...], 0.0)


def _choose_batch_tiling(B, tile_b):
    """Pick (TB, B_P): batch tile size and minimally padded batch.

    Multiples of 16 sublanes (bf16 packing); >= 2 tiles when the batch
    permits (so the "parallel" grid axis spans both v7x TensorCores);
    snap to MXU M-granularity only if it doesn't blow up batch padding.
    """
    SUB = 16
    B8 = _round_up(B, 8)
    min_tiles = 2 if B8 >= 2 * SUB else 1
    n_tiles = max(pl.cdiv(B8, max(tile_b, SUB)), min_tiles)
    if n_tiles == 1:
        return B8, B8                     # single full-array tile (always legal)
    TB = _round_up(pl.cdiv(B8, n_tiles), SUB)
    base_pad = pl.cdiv(B8, TB) * TB
    for gran in (256, 128):               # MXU M granularity (v6e/v7x, v5e)
        if TB > gran and TB % gran != 0:
            snapped = _round_up(TB, gran)
            if pl.cdiv(B8, snapped) * snapped <= base_pad + gran:
                TB = snapped
            break
    return TB, pl.cdiv(B8, TB) * TB


def _vmem_limit_bytes(TB, IN, HID_P, OUT_P):
    # Rough footprint: double-buffered x (bf16) and out (f32), single-buffered
    # resident params, plus f32 intermediates for h / y.
    need = (
        2 * TB * IN * 2
        + 2 * TB * OUT_P * 4
        + (IN * HID_P + HID_P * OUT_P) * 2
        + (HID_P + OUT_P) * 4
        + TB * HID_P * 4
        + TB * OUT_P * 4
    )
    try:
        phys = int(pltpu.get_tpu_info().vmem_capacity_bytes)
    except Exception:
        phys = 64 * 1024 * 1024           # v7x per-core; conservative elsewhere
    limit = max(2 * need, 32 * 1024 * 1024)
    return int(min(limit, (phys * 3) // 4))


def dqn_forward(x, w1, b1, w2, b2, *, tile_b=1024):
    """Fused 2-layer MLP forward.

    x:  [B, IN];  w1: [HID, IN] (PyTorch nn.Linear layout), b1: [HID]
    w2: [OUT, HID], b2: [OUT].  Returns [B, OUT] float32.
    """
    B, IN = x.shape
    HID = w1.shape[0]
    OUT = w2.shape[0]

    LANE = 128
    HID_P = _round_up(HID, LANE)
    OUT_P = _round_up(OUT, LANE)

    TB, B_P = _choose_batch_tiling(B, tile_b)
    grid = (B_P // TB,)

    f32, bf16 = jnp.float32, jnp.bfloat16

    # Streamed activation: bf16, batch padded minimally, IN left unpadded.
    if B_P == B:
        x_bf = x.astype(bf16)
    else:
        x_bf = jnp.zeros((B_P, IN), bf16).at[:B, :].set(x.astype(bf16))

    # Resident parameters: pre-transposed, feature dims zero-padded to the
    # lane width.  Padding is exact: padded hidden units get bias 0 ->
    # relu 0 -> contribute nothing to layer 2.  Weights bf16, biases f32.
    w1_t = jnp.zeros((IN, HID_P), bf16).at[:, :HID].set(w1.T.astype(bf16))
    b1_p = jnp.zeros((1, HID_P), f32).at[0, :HID].set(b1.astype(f32))
    w2_t = jnp.zeros((HID_P, OUT_P), bf16).at[:HID, :OUT].set(w2.T.astype(bf16))
    b2_p = jnp.zeros((1, OUT_P), f32).at[0, :OUT].set(b2.astype(f32))

    flops = 2 * B_P * (IN * HID_P + HID_P * OUT_P)
    bytes_accessed = (
        2 * B_P * IN                          # streamed x (bf16)
        + 2 * (IN * HID_P + HID_P * OUT_P)    # resident weights (bf16, once)
        + 4 * (HID_P + OUT_P)                 # biases (f32, once)
        + 4 * B_P * OUT_P                     # streamed out (f32)
    )
    cost = pl.CostEstimate(
        flops=flops, transcendentals=0, bytes_accessed=bytes_accessed
    )
    vmem_limit = _vmem_limit_bytes(TB, IN, HID_P, OUT_P)

    def make_call(single_buffer_resident):
        def resident(shape):
            kw = {}
            if single_buffer_resident:
                kw["pipeline_mode"] = pl.Buffered(1)   # constant index_map -> 1 buf
            return pl.BlockSpec(shape, lambda i: (0, 0), **kw)

        return pl.pallas_call(
            dqn_kernel,
            out_shape=jax.ShapeDtypeStruct((B_P, OUT_P), f32),
            grid=grid,
            in_specs=[
                pl.BlockSpec((TB, IN), lambda i: (i, 0)),   # streamed per batch tile
                resident((IN, HID_P)),                      # VMEM-resident
                resident((1, HID_P)),
                resident((HID_P, OUT_P)),
                resident((1, OUT_P)),
            ],
            out_specs=pl.BlockSpec((TB, OUT_P), lambda i: (i, 0)),
            compiler_params=pltpu.CompilerParams(
                dimension_semantics=("parallel",),   # batch tiles across TCs (v7x)
                vmem_limit_bytes=vmem_limit,
            ),
            cost_estimate=cost,
        )

    args = (x_bf, w1_t, b1_p, w2_t, b2_p)
    try:
        out_p = make_call(True)(*args)
    except Exception:
        # Some Pallas versions reject single-buffered residents (Buffered(1));
        # fall back to default double-buffering — identical results.
        out_p = make_call(False)(*args)

    if B_P == B and OUT_P == OUT:
        return out_p
    return out_p[:B, :OUT]


def xavier_normal(key, out_features, in_features):
    # nn.init.xavier_normal_ on a [out, in] weight: std = sqrt(2/(in+out))
    std = math.sqrt(2.0 / (in_features + out_features))
    return std * jax.random.normal(key, (out_features, in_features), jnp.float32)


def linear_bias_default(key, out_features, in_features):
    # PyTorch nn.Linear default bias init: U(-1/sqrt(in), 1/sqrt(in))
    bound = 1.0 / math.sqrt(in_features)
    return jax.random.uniform(
        key, (out_features,), jnp.float32, minval=-bound, maxval=bound
    )


if __name__ == "__main__":
    # Small shapes consistent with the module (forward works for any sizes).
    B, IN, HID, OUT = 8, 16, 32, 8

    key = jax.random.PRNGKey(0)
    k_x, k_w1, k_b1, k_w2, k_b2 = jax.random.split(key, 5)

    x = jax.random.normal(k_x, (B, IN), jnp.float32)

    w1 = xavier_normal(k_w1, HID, IN)          # [HID, IN] (PyTorch layout)
    b1 = linear_bias_default(k_b1, HID, IN)    # [HID]
    w2 = xavier_normal(k_w2, OUT, HID)         # [OUT, HID]
    b2 = linear_bias_default(k_b2, OUT, HID)   # [OUT]

    out = dqn_forward(x, w1, b1, w2, b2)
    out = jax.block_until_ready(out)

    # Reference in plain f32 JAX (same math as the PyTorch forward, including
    # the trailing ReLU; the .view(x.size(0), -1) is a no-op for 2-D x).
    ref = jnp.maximum(jnp.maximum(x @ w1.T + b1, 0.0) @ w2.T + b2, 0.0)
    assert out.shape == (B, OUT)
    # bf16 MXU operands (f32 accumulation) -> loosened tolerance vs f32 ref.
    assert jnp.allclose(out, ref, atol=5e-2, rtol=5e-2), (
        float(jnp.max(jnp.abs(out - ref)))
    )

    print("KERNEL_OK")
</pallas_src>

<mosaic_0001>
module attributes {stable_mosaic.version = 11 : i64} {
  func.func @dqn_kernel(%arg0: i32, %arg1: memref<8x16xbf16, #tpu.memory_space<vmem>>, %arg2: memref<16x128xbf16, #tpu.memory_space<vmem>>, %arg3: memref<1x128xf32, #tpu.memory_space<vmem>>, %arg4: memref<128x128xbf16, #tpu.memory_space<vmem>>, %arg5: memref<1x128xf32, #tpu.memory_space<vmem>>, %arg6: memref<8x128xf32, #tpu.memory_space<vmem>>) attributes {dimension_semantics = [#tpu.dimension_semantics<parallel>], iteration_bounds = array<i64: 1>, scalar_prefetch = 0 : i64, scratch_operands = 0 : i64, tpu.core_type = #tpu.core_type<tc>, window_params = [{transform_indices = @transform_0, window_bounds = array<i64: 8, 16>}, {pipeline_mode = #tpu.pipeline_mode<synchronous>, transform_indices = @transform_1, window_bounds = array<i64: 16, 128>}, {pipeline_mode = #tpu.pipeline_mode<synchronous>, transform_indices = @transform_2, window_bounds = array<i64: 1, 128>}, {pipeline_mode = #tpu.pipeline_mode<synchronous>, transform_indices = @transform_3, window_bounds = array<i64: 128, 128>}, {pipeline_mode = #tpu.pipeline_mode<synchronous>, transform_indices = @transform_4, window_bounds = array<i64: 1, 128>}, {transform_indices = @transform_5, window_bounds = array<i64: 8, 128>}]} {
    %c0 = arith.constant 0 : index
    %c0_0 = arith.constant 0 : index
    %0 = vector.load %arg1[%c0, %c0_0] : memref<8x16xbf16, #tpu.memory_space<vmem>>, vector<8x16xbf16>
    %c0_1 = arith.constant 0 : index
    %c0_2 = arith.constant 0 : index
    %1 = vector.load %arg2[%c0_1, %c0_2] : memref<16x128xbf16, #tpu.memory_space<vmem>>, vector<16x128xbf16>
    %cst = arith.constant dense<0.000000e+00> : vector<8x128xf32>
    %2 = tpu.matmul %0, %1, %cst {dimension_numbers = #tpu.dot_dimension_numbers<[1], [0], [0], [1], [0, 0, 1, 1], [], []>} : vector<8x16xbf16>, vector<16x128xbf16>, vector<8x128xf32> -> vector<8x128xf32>
    %c0_3 = arith.constant 0 : index
    %c0_4 = arith.constant 0 : index
    %3 = vector.load %arg3[%c0_3, %c0_4] : memref<1x128xf32, #tpu.memory_space<vmem>>, vector<1x128xf32>
    %4 = vector.broadcast %3 : vector<1x128xf32> to vector<8x128xf32>
    %5 = arith.addf %2, %4 : vector<8x128xf32>
    %cst_5 = arith.constant 0.000000e+00 : f32
    %6 = vector.broadcast %cst_5 : f32 to vector<8x128xf32>
    %7 = arith.maximumf %5, %6 : vector<8x128xf32>
    %8 = arith.truncf %7 : vector<8x128xf32> to vector<8x128xbf16>
    %c0_6 = arith.constant 0 : index
    %c0_7 = arith.constant 0 : index
    %9 = vector.load %arg4[%c0_6, %c0_7] : memref<128x128xbf16, #tpu.memory_space<vmem>>, vector<128x128xbf16>
    %cst_8 = arith.constant dense<0.000000e+00> : vector<8x128xf32>
    %10 = tpu.matmul %8, %9, %cst_8 {dimension_numbers = #tpu.dot_dimension_numbers<[1], [0], [0], [1], [0, 0, 1, 1], [], []>} : vector<8x128xbf16>, vector<128x128xbf16>, vector<8x128xf32> -> vector<8x128xf32>
    %c0_9 = arith.constant 0 : index
    %c0_10 = arith.constant 0 : index
    %11 = vector.load %arg5[%c0_9, %c0_10] : memref<1x128xf32, #tpu.memory_space<vmem>>, vector<1x128xf32>
    %12 = vector.broadcast %11 : vector<1x128xf32> to vector<8x128xf32>
    %13 = arith.addf %10, %12 : vector<8x128xf32>
    %cst_11 = arith.constant 0.000000e+00 : f32
    %14 = vector.broadcast %cst_11 : f32 to vector<8x128xf32>
    %15 = arith.maximumf %13, %14 : vector<8x128xf32>
    %c0_12 = arith.constant 0 : index
    %c0_13 = arith.constant 0 : index
    %16 = vector.load %arg6[%c0_12, %c0_13] : memref<8x128xf32, #tpu.memory_space<vmem>>, vector<8x128xf32>
    tpu.vector_store %arg6[%c0_12, %c0_13], %15 {strides = array<i32>} : memref<8x128xf32, #tpu.memory_space<vmem>>, vector<8x128xf32>,
    return
  }
  func.func @transform_0(%arg0: i32) -> (i32, i32) {
    %c0_i32 = arith.constant 0 : i32
    %c0_i32_0 = arith.constant 0 : i32
    return %arg0, %c0_i32 : i32, i32
  }
  func.func @transform_1(%arg0: i32) -> (i32, i32) {
    %c0_i32 = arith.constant 0 : i32
    %c0_i32_0 = arith.constant 0 : i32
    %c0_i32_1 = arith.constant 0 : i32
    return %c0_i32, %c0_i32_0 : i32, i32
  }
  func.func @transform_2(%arg0: i32) -> (i32, i32) {
    %c0_i32 = arith.constant 0 : i32
    %c0_i32_0 = arith.constant 0 : i32
    %c0_i32_1 = arith.constant 0 : i32
    return %c0_i32, %c0_i32_0 : i32, i32
  }
  func.func @transform_3(%arg0: i32) -> (i32, i32) {
    %c0_i32 = arith.constant 0 : i32
    %c0_i32_0 = arith.constant 0 : i32
    %c0_i32_1 = arith.constant 0 : i32
    return %c0_i32, %c0_i32_0 : i32, i32
  }
  func.func @transform_4(%arg0: i32) -> (i32, i32) {
    %c0_i32 = arith.constant 0 : i32
    %c0_i32_0 = arith.constant 0 : i32
    %c0_i32_1 = arith.constant 0 : i32
    return %c0_i32, %c0_i32_0 : i32, i32
  }
  func.func @transform_5(%arg0: i32) -> (i32, i32) {
    %c0_i32 = arith.constant 0 : i32
    %c0_i32_0 = arith.constant 0 : i32
    return %arg0, %c0_i32 : i32, i32
  }
}

module attributes {stable_mosaic.version = 11 : i64} {
  func.func @dqn_kernel(%arg0: i32, %arg1: memref<8x16xbf16, #tpu.memory_space<vmem>>, %arg2: memref<16x128xbf16, #tpu.memory_space<vmem>>, %arg3: memref<1x128xf32, #tpu.memory_space<vmem>>, %arg4: memref<128x128xbf16, #tpu.memory_space<vmem>>, %arg5: memref<1x128xf32, #tpu.memory_space<vmem>>, %arg6: memref<8x128xf32, #tpu.memory_space<vmem>>) attributes {dimension_semantics = [#tpu.dimension_semantics<parallel>], iteration_bounds = array<i64: 1>, scalar_prefetch = 0 : i64, scratch_operands = 0 : i64, tpu.core_type = #tpu.core_type<tc>, window_params = [{transform_indices = @transform_0, window_bounds = array<i64: 8, 16>}, {pipeline_mode = #tpu.pipeline_mode<synchronous>, transform_indices = @transform_1, window_bounds = array<i64: 16, 128>}, {pipeline_mode = #tpu.pipeline_mode<synchronous>, transform_indices = @transform_2, window_bounds = array<i64: 1, 128>}, {pipeline_mode = #tpu.pipeline_mode<synchronous>, transform_indices = @transform_3, window_bounds = array<i64: 128, 128>}, {pipeline_mode = #tpu.pipeline_mode<synchronous>, transform_indices = @transform_4, window_bounds = array<i64: 1, 128>}, {transform_indices = @transform_5, window_bounds = array<i64: 8, 128>}]} {
    %c0 = arith.constant 0 : index
    %c0_0 = arith.constant 0 : index
    %0 = vector.load %arg1[%c0, %c0_0] : memref<8x16xbf16, #tpu.memory_space<vmem>>, vector<8x16xbf16>
    %c0_1 = arith.constant 0 : index
    %c0_2 = arith.constant 0 : index
    %1 = vector.load %arg2[%c0_1, %c0_2] : memref<16x128xbf16, #tpu.memory_space<vmem>>, vector<16x128xbf16>
    %cst = arith.constant dense<0.000000e+00> : vector<8x128xf32>
    %2 = tpu.matmul %0, %1, %cst {dimension_numbers = #tpu.dot_dimension_numbers<[1], [0], [0], [1], [0, 0, 1, 1], [], []>} : vector<8x16xbf16>, vector<16x128xbf16>, vector<8x128xf32> -> vector<8x128xf32>
    %c0_3 = arith.constant 0 : index
    %c0_4 = arith.constant 0 : index
    %3 = vector.load %arg3[%c0_3, %c0_4] : memref<1x128xf32, #tpu.memory_space<vmem>>, vector<1x128xf32>
    %4 = vector.broadcast %3 : vector<1x128xf32> to vector<8x128xf32>
    %5 = arith.addf %2, %4 : vector<8x128xf32>
    %cst_5 = arith.constant 0.000000e+00 : f32
    %6 = vector.broadcast %cst_5 : f32 to vector<8x128xf32>
    %7 = arith.maximumf %5, %6 : vector<8x128xf32>
    %8 = arith.truncf %7 : vector<8x128xf32> to vector<8x128xbf16>
    %c0_6 = arith.constant 0 : index
    %c0_7 = arith.constant 0 : index
    %9 = vector.load %arg4[%c0_6, %c0_7] : memref<128x128xbf16, #tpu.memory_space<vmem>>, vector<128x128xbf16>
    %cst_8 = arith.constant dense<0.000000e+00> : vector<8x128xf32>
    %10 = tpu.matmul %8, %9, %cst_8 {dimension_numbers = #tpu.dot_dimension_numbers<[1], [0], [0], [1], [0, 0, 1, 1], [], []>} : vector<8x128xbf16>, vector<128x128xbf16>, vector<8x128xf32> -> vector<8x128xf32>
    %c0_9 = arith.constant 0 : index
    %c0_10 = arith.constant 0 : index
    %11 = vector.load %arg5[%c0_9, %c0_10] : memref<1x128xf32, #tpu.memory_space<vmem>>, vector<1x128xf32>
    %12 = vector.broadcast %11 : vector<1x128xf32> to vector<8x128xf32>
    %13 = arith.addf %10, %12 : vector<8x128xf32>
    %cst_11 = arith.constant 0.000000e+00 : f32
    %14 = vector.broadcast %cst_11 : f32 to vector<8x128xf32>
    %15 = arith.maximumf %13, %14 : vector<8x128xf32>
    %c0_12 = arith.constant 0 : index
    %c0_13 = arith.constant 0 : index
    %16 = vector.load %arg6[%c0_12, %c0_13] : memref<8x128xf32, #tpu.memory_space<vmem>>, vector<8x128xf32>
    tpu.vector_store %arg6[%c0_12, %c0_13], %15 {strides = array<i32>} : memref<8x128xf32, #tpu.memory_space<vmem>>, vector<8x128xf32>,
    return
  }
  func.func @transform_0(%arg0: i32) -> (i32, i32) {
    %c0_i32 = arith.constant 0 : i32
    %c0_i32_0 = arith.constant 0 : i32
    return %arg0, %c0_i32 : i32, i32
  }
  func.func @transform_1(%arg0: i32) -> (i32, i32) {
    %c0_i32 = arith.constant 0 : i32
    %c0_i32_0 = arith.constant 0 : i32
    %c0_i32_1 = arith.constant 0 : i32
    return %c0_i32, %c0_i32_0 : i32, i32
  }
  func.func @transform_2(%arg0: i32) -> (i32, i32) {
    %c0_i32 = arith.constant 0 : i32
    %c0_i32_0 = arith.constant 0 : i32
    %c0_i32_1 = arith.constant 0 : i32
    return %c0_i32, %c0_i32_0 : i32, i32
  }
  func.func @transform_3(%arg0: i32) -> (i32, i32) {
    %c0_i32 = arith.constant 0 : i32
    %c0_i32_0 = arith.constant 0 : i32
    %c0_i32_1 = arith.constant 0 : i32
    return %c0_i32, %c0_i32_0 : i32, i32
  }
  func.func @transform_4(%arg0: i32) -> (i32, i32) {
    %c0_i32 = arith.constant 0 : i32
    %c0_i32_0 = arith.constant 0 : i32
    %c0_i32_1 = arith.constant 0 : i32
    return %c0_i32, %c0_i32_0 : i32, i32
  }
  func.func @transform_5(%arg0: i32) -> (i32, i32) {
    %c0_i32 = arith.constant 0 : i32
    %c0_i32_0 = arith.constant 0 : i32
    return %arg0, %c0_i32 : i32, i32
  }
}

</mosaic_0001>

<bundles_post_ra>
// kernel: tpu_custom_call.1
= control target key start
LH: loop header
LB: loop body
LE: loop exit
PB: predicated region body
PF: predicated region fallthrough
CT: control target
= control target key end

     0   :  { %10 = vsyncpa [#allocation3], 0  ;;  %s410_s0 = inlined_call_operand.hbm [shape: bf16[8,16], index: 0, kind: input, shape index: {}]   ;;  %s411_s1 = inlined_call_operand.hbm [shape: bf16[16,128], index: 1, kind: input, shape index: {}]   ;;  %s412_s2 = inlined_call_operand.vmem [shape: f32[1,128], index: 2, kind: input, shape index: {}]   ;;  %s413_s3 = inlined_call_operand.hbm [shape: bf16[128,128], index: 3, kind: input, shape index: {}]   ;;  %s414_s4 = inlined_call_operand.vmem [shape: f32[1,128], index: 4, kind: input, shape index: {}]   ;;  %s415_s5 = inlined_call_operand.hbm [shape: f32[8,128], index: 5, kind: output, shape index: {}]  }
   0x1   :  { %11 = vsyncpa [#allocation6], 0  ;;  %s28_s20 = sshll.u32 %s411_s1, 4  ;;  %s29_s20 = int_to_ptr.hbm [resolvable:$true] %s28_s20 }
   0x2   :  { %12 = vsyncpa [#allocation4], 0  ;;  %s356_s21 = smov [#allocation5]   ;;  %s18_s25 = sshll.u32 %s410_s0, 4  ;;  %s19_s25 = int_to_ptr.hbm [resolvable:$true] %s18_s25 }
   0x3   :  { %s30_s22 = sshll.u32 %s356_s21, 4  ;;  %s357_s26 = smov 64   ;;  %s31_s22 = int_to_ptr.vmem [resolvable:$true] %s30_s22 }
   0x4   :  { %s358_s27 = smov 4   ;;  %s359_s28 = smov [#allocation2]  }
   0x5   :  { %36 = dma.hbm_to_vmem [thread:$0]  %s29_s20, 128, %s31_s22, [#allocation6], %s357_s26, %s357_s26, %s358_s27  }
   0x6   :  { %s20_s29 = sshll.u32 %s359_s28, 4  ;;  %s43_s7 = sshll.u32 %s413_s3, 4  ;;  %s21_s29 = int_to_ptr.vmem [resolvable:$true] %s20_s29  ;;  %s44_s7 = int_to_ptr.hbm [resolvable:$true] %s43_s7 }
   0x7   :  { %23 = dma.hbm_to_vmem [thread:$0]  %s19_s25, 64, %s21_s29, [#allocation3]  }
   0x8   :  { %s360_s1 = smov [#allocation7]  }
   0x9   :  { %s45_s8 = sshll.u32 %s360_s1, 4  ;;  %s46_s8 = int_to_ptr.vmem [resolvable:$true] %s45_s8 }
   0xa   :  { %51 = dma.hbm_to_vmem [thread:$0]  %s44_s7, 1024, %s46_s8, [#allocation6], %s357_s26, %s357_s26, %s358_s27  }
   0xb   :  { %350 = dma.done.wait [#allocation3], 64  }
   0xc   :  { %351 = vsyncadd [#allocation3], 4294967232 }
   0xd   :  { %352 = dma.done.wait [#allocation6], 1152  }
   0xe   :  { %353 = vsyncadd [#allocation6], 4294966144  ;;  %v237_v0 = vld [vmem:[#allocation5] sm:$0xff]  ;;  %v67_v2 = vld [vmem:[#allocation2] sm:$0xf]  ;;  %vm80_vm0 = vcmask 130048  }
   0xf   :  { %v245_v1 = vld [vmem:[#allocation7 + $0x38] sm:$0xff]  ;;  %91 = vmatpush.bf16.msra.mxu0 %v237_v0  ;;  %v244_v3 = vld [vmem:[#allocation7 + $0x30] sm:$0xff]  ;;  %v243_v4 = vld [vmem:[#allocation7 + $0x28] sm:$0xff]  ;;  %s361_s11 = smov [#allocation8]   ;;  %s189_s15 = sshll.u32 %s415_s5, 4  ;;  %s190_s15 = int_to_ptr.hbm [resolvable:$true] %s189_s15 }
  0x10   :  { %167 = vmatpush.bf16.msra.mxu1 %v245_v1  ;;  %v242_v5 = vld [vmem:[#allocation7 + $0x20] sm:$0xff]  ;;  %v241_v6 = vld [vmem:[#allocation7 + $0x18] sm:$0xff]  ;;  %v240_v7 = vld [vmem:[#allocation7 + $0x10] sm:$0xff]  ;;  %s187_s12 = sshll.u32 %s361_s11, 4  ;;  %s188_s12 = int_to_ptr.vmem [resolvable:$true] %s187_s12 }
  0x11   :  { %v239_v8 = vld [vmem:[#allocation7 + $0x8] sm:$0xff]  ;;  %v238_v9 = vld [vmem:[#allocation7] sm:$0xff]  ;;  %v252_v10 = vld [vmem:[%s412_s2] ss:$0 sm:$0xff] }
  0x12   :  { %204 = vmatmul.msk.bf16.vlgmr.msra.gmra.mxu0 %vm80_vm0, %v67_v2  ;;  %v253_v16 = vld [vmem:[%s414_s4] ss:$0 sm:$0xff] }
  0x14   :  { %168 = vmatpush.bf16.msra.mxu1 %v244_v3 }
  0x18   :  { %169 = vmatpush.bf16.msra.mxu1 %v243_v4 }
  0x1c   :  { %170 = vmatpush.bf16.msra.mxu1 %v242_v5 }
  0x20   :  { %171 = vmatpush.bf16.msra.mxu1 %v241_v6 }
  0x24   :  { %172 = vmatpush.bf16.msra.mxu1 %v240_v7 }
  0x28   :  { %173 = vmatpush.bf16.msra.mxu1 %v239_v8 }
  0x2c   :  { %174 = vmatpush.bf16.msra.mxu1 %v238_v9 }
  0x8f   :  { %v93_v11 = vpop.f32.mrf.mxu0 }
  0x90   :  { %v94_v12 = vadd.f32 %v252_v10, %v93_v11 }
  0x92   :  { %v97_v13 = vmax.f32 %v94_v12, 0.0 }
  0x94   :  { %v98_v14 = vpack.c.bf16 %v97_v13, %v97_v13 }
  0x96   :  { %175 = vmatmul.bf16.vlgmr.msra.gmra.mxu1 %v98_v14 }
  0x97   :  { %v95_v15 = vpop.f32.mrf.mxu0 }
 0x113   :  { %v176_v17 = vpop.f32.mrf.mxu1 }
 0x114   :  { %v177_v18 = vadd.f32 %v253_v16, %v176_v17 }
 0x116   :  { %v180_v19 = vmax.f32 %v177_v18, 0.0 }
 0x118   :  { %181 = vst [vmem:[#allocation8] sm:$0xff] %v180_v19 }
 0x119   :  { %192 = dma.vmem_to_hbm [thread:$0]  %s188_s12, 128, %s190_s15, [#allocation4]  }
 0x11b   :  { %v178_v20 = vpop.f32.mrf.mxu1 }
 0x11c   :  { %354 = dma.done.wait [#allocation4], 128  }
 0x11d   :  { %355 = vsyncadd [#allocation4], 4294967168 }
 0x11e   :  { %197 = vsyncpa [#allocation3], 1 }
 0x11f   :  { %198 = vsyncpa [#allocation6], 1 }
 0x120   :  { %199 = vsyncpa [#allocation4], 1 }

// kernel: tpu_custom_call.1
= control target key start
LH: loop header
LB: loop body
LE: loop exit
PB: predicated region body
PF: predicated region fallthrough
CT: control target
= control target key end

     0   :  { %10 = vsyncpa [#allocation3], 0  ;;  %s410_s0 = inlined_call_operand.hbm [shape: bf16[8,16], index: 0, kind: input, shape index: {}]   ;;  %s411_s1 = inlined_call_operand.hbm [shape: bf16[16,128], index: 1, kind: input, shape index: {}]   ;;  %s412_s2 = inlined_call_operand.vmem [shape: f32[1,128], index: 2, kind: input, shape index: {}]   ;;  %s413_s3 = inlined_call_operand.hbm [shape: bf16[128,128], index: 3, kind: input, shape index: {}]   ;;  %s414_s4 = inlined_call_operand.vmem [shape: f32[1,128], index: 4, kind: input, shape index: {}]   ;;  %s415_s5 = inlined_call_operand.hbm [shape: f32[8,128], index: 5, kind: output, shape index: {}]  }
   0x1   :  { %11 = vsyncpa [#allocation6], 0  ;;  %s28_s20 = sshll.u32 %s411_s1, 4  ;;  %s29_s20 = int_to_ptr.hbm [resolvable:$true] %s28_s20 }
   0x2   :  { %12 = vsyncpa [#allocation4], 0  ;;  %s356_s21 = smov [#allocation5]   ;;  %s18_s25 = sshll.u32 %s410_s0, 4  ;;  %s19_s25 = int_to_ptr.hbm [resolvable:$true] %s18_s25 }
   0x3   :  { %s30_s22 = sshll.u32 %s356_s21, 4  ;;  %s357_s26 = smov 64   ;;  %s31_s22 = int_to_ptr.vmem [resolvable:$true] %s30_s22 }
   0x4   :  { %s358_s27 = smov 4   ;;  %s359_s28 = smov [#allocation2]  }
   0x5   :  { %36 = dma.hbm_to_vmem [thread:$0]  %s29_s20, 128, %s31_s22, [#allocation6], %s357_s26, %s357_s26, %s358_s27  }
   0x6   :  { %s20_s29 = sshll.u32 %s359_s28, 4  ;;  %s43_s7 = sshll.u32 %s413_s3, 4  ;;  %s21_s29 = int_to_ptr.vmem [resolvable:$true] %s20_s29  ;;  %s44_s7 = int_to_ptr.hbm [resolvable:$true] %s43_s7 }
   0x7   :  { %23 = dma.hbm_to_vmem [thread:$0]  %s19_s25, 64, %s21_s29, [#allocation3]  }
   0x8   :  { %s360_s1 = smov [#allocation7]  }
   0x9   :  { %s45_s8 = sshll.u32 %s360_s1, 4  ;;  %s46_s8 = int_to_ptr.vmem [resolvable:$true] %s45_s8 }
   0xa   :  { %51 = dma.hbm_to_vmem [thread:$0]  %s44_s7, 1024, %s46_s8, [#allocation6], %s357_s26, %s357_s26, %s358_s27  }
   0xb   :  { %350 = dma.done.wait [#allocation3], 64  }
   0xc   :  { %351 = vsyncadd [#allocation3], 4294967232 }
   0xd   :  { %352 = dma.done.wait [#allocation6], 1152  }
   0xe   :  { %353 = vsyncadd [#allocation6], 4294966144  ;;  %v237_v0 = vld [vmem:[#allocation5] sm:$0xff]  ;;  %v67_v2 = vld [vmem:[#allocation2] sm:$0xf]  ;;  %vm80_vm0 = vcmask 130048  }
   0xf   :  { %v245_v1 = vld [vmem:[#allocation7 + $0x38] sm:$0xff]  ;;  %91 = vmatpush.bf16.msra.mxu0 %v237_v0  ;;  %v244_v3 = vld [vmem:[#allocation7 + $0x30] sm:$0xff]  ;;  %v243_v4 = vld [vmem:[#allocation7 + $0x28] sm:$0xff]  ;;  %s361_s11 = smov [#allocation8]   ;;  %s189_s15 = sshll.u32 %s415_s5, 4  ;;  %s190_s15 = int_to_ptr.hbm [resolvable:$true] %s189_s15 }
  0x10   :  { %167 = vmatpush.bf16.msra.mxu1 %v245_v1  ;;  %v242_v5 = vld [vmem:[#allocation7 + $0x20] sm:$0xff]  ;;  %v241_v6 = vld [vmem:[#allocation7 + $0x18] sm:$0xff]  ;;  %v240_v7 = vld [vmem:[#allocation7 + $0x10] sm:$0xff]  ;;  %s187_s12 = sshll.u32 %s361_s11, 4  ;;  %s188_s12 = int_to_ptr.vmem [resolvable:$true] %s187_s12 }
  0x11   :  { %v239_v8 = vld [vmem:[#allocation7 + $0x8] sm:$0xff]  ;;  %v238_v9 = vld [vmem:[#allocation7] sm:$0xff]  ;;  %v252_v10 = vld [vmem:[%s412_s2] ss:$0 sm:$0xff] }
  0x12   :  { %204 = vmatmul.msk.bf16.vlgmr.msra.gmra.mxu0 %vm80_vm0, %v67_v2  ;;  %v253_v16 = vld [vmem:[%s414_s4] ss:$0 sm:$0xff] }
  0x14   :  { %168 = vmatpush.bf16.msra.mxu1 %v244_v3 }
  0x18   :  { %169 = vmatpush.bf16.msra.mxu1 %v243_v4 }
  0x1c   :  { %170 = vmatpush.bf16.msra.mxu1 %v242_v5 }
  0x20   :  { %171 = vmatpush.bf16.msra.mxu1 %v241_v6 }
  0x24   :  { %172 = vmatpush.bf16.msra.mxu1 %v240_v7 }
  0x28   :  { %173 = vmatpush.bf16.msra.mxu1 %v239_v8 }
  0x2c   :  { %174 = vmatpush.bf16.msra.mxu1 %v238_v9 }
  0x8f   :  { %v93_v11 = vpop.f32.mrf.mxu0 }
  0x90   :  { %v94_v12 = vadd.f32 %v252_v10, %v93_v11 }
  0x92   :  { %v97_v13 = vmax.f32 %v94_v12, 0.0 }
  0x94   :  { %v98_v14 = vpack.c.bf16 %v97_v13, %v97_v13 }
  0x96   :  { %175 = vmatmul.bf16.vlgmr.msra.gmra.mxu1 %v98_v14 }
  0x97   :  { %v95_v15 = vpop.f32.mrf.mxu0 }
 0x113   :  { %v176_v17 = vpop.f32.mrf.mxu1 }
 0x114   :  { %v177_v18 = vadd.f32 %v253_v16, %v176_v17 }
 0x116   :  { %v180_v19 = vmax.f32 %v177_v18, 0.0 }
 0x118   :  { %181 = vst [vmem:[#allocation8] sm:$0xff] %v180_v19 }
 0x119   :  { %192 = dma.vmem_to_hbm [thread:$0]  %s188_s12, 128, %s190_s15, [#allocation4]  }
 0x11b   :  { %v178_v20 = vpop.f32.mrf.mxu1 }
 0x11c   :  { %354 = dma.done.wait [#allocation4], 128  }
 0x11d   :  { %355 = vsyncadd [#allocation4], 4294967168 }
 0x11e   :  { %197 = vsyncpa [#allocation3], 1 }
 0x11f   :  { %198 = vsyncpa [#allocation6], 1 }
 0x120   :  { %199 = vsyncpa [#allocation4], 1 }

</bundles_post_ra>
